<compile_context>
chip_gen: v7x
topology: tpu7x:2x2x1
jax: 0.10.0
libtpu: 0.0.40
codegen_flags: <defaults>
</compile_context>

<pallas_src>
import jax
import jax.numpy as jnp
from jax.experimental import pallas as pl
from jax.experimental.pallas import tpu as pltpu


# ----------------------------- Pallas kernel ------------------------------- #
def _downconv_kernel(xm_ref, xh_ref, w_ref, o_ref):
    """Fused stride-2 3x3 conv (no bias) + LeakyReLU(0.2) for one row block.

    xm_ref: (4, TH, WH, C)  parity grids, sub-rows [r0, r0+TH) of this block
    xh_ref: (4, 1,  WH, C)  parity grids, halo sub-row r0+TH
    w_ref : (9*C, OUTC)     weight rows ordered (ki, kj, c)
    o_ref : (TH*WO, OUTC)   output pixels (row-major) for this block
    """
    _, th, wh, c = xm_ref.shape
    wo = wh - 1
    acc = jnp.zeros(o_ref.shape, jnp.float32)
    for ki in range(3):
        for kj in range(3):
            p = (ki % 2) * 2 + (kj % 2)      # which parity grid
            dr, dc = ki // 2, kj // 2        # sub-grid row/col offset (0 or 1)
            if dr == 0:
                tap = xm_ref[p, :, dc:dc + wo, :]                       # (TH, WO, C)
            else:
                # rows r0+1 .. r0+TH : main rows 1..TH-1 plus the halo row.
                tap = jnp.concatenate(
                    [xm_ref[p, 1:, dc:dc + wo, :],
                     xh_ref[p, :, dc:dc + wo, :]], axis=0)              # (TH, WO, C)
            a = tap.reshape(th * wo, c)      # WO is a multiple of 8 in practice -> cheap
            t = ki * 3 + kj
            acc = acc + jnp.dot(a, w_ref[t * c:(t + 1) * c, :],
                                preferred_element_type=jnp.float32)
    acc = jnp.where(acc > 0, acc, 0.2 * acc)                            # LeakyReLU(0.2)
    o_ref[...] = acc.astype(o_ref.dtype)


# ------------------------------ JAX wrapper -------------------------------- #
def _round_up(a, b):
    return (a + b - 1) // b * b


def _choose_row_block(ho, wo, c, outc, itemsize):
    """Output rows per grid step: multiple of 8, ~1024 output pixels, VMEM-capped."""
    th = max(8, (1024 // max(wo, 1)) // 8 * 8)
    th = min(th, _round_up(ho, 8))
    lane = 128

    def vmem_bytes(t):
        wh_p = _round_up(wo + 1, 8)
        c_p = _round_up(max(c, 1), lane)
        oc_p = _round_up(max(outc, 1), lane)
        in_main = 4 * t * wh_p * c_p * itemsize
        in_halo = 4 * 8 * wh_p * c_p * itemsize
        out_blk = _round_up(t * wo, 8) * oc_p * itemsize
        w_blk = _round_up(9 * c, 8) * oc_p * itemsize
        return 2 * (in_main + in_halo + out_blk) + w_blk   # double buffered

    while th > 8 and vmem_bytes(th) > 24 * 1024 * 1024:    # safe for v7x 64 MiB VMEM
        th -= 8
    return th


def down_conv_forward(x, weight, *, stride=2, padding=1, compute_dtype=jnp.float32):
    """x: (N, C, H, W), weight: (outc, C, 3, 3) -> (N, outc, Ho, Wo)."""
    n, c, h, w = x.shape
    outc, c2, kh, kw = weight.shape
    if (c2, kh, kw) != (c, 3, 3) or stride != 2 or padding != 1:
        raise ValueError("kernel is specialized to kernel_size=3, stride=2, padding=1")
    ho = (h + 2 * padding - kh) // stride + 1
    wo = (w + 2 * padding - kw) // stride + 1

    itemsize = jnp.dtype(compute_dtype).itemsize
    th = _choose_row_block(ho, wo, c, outc, itemsize)
    nb = -(-ho // th)            # cdiv: no divisibility assert on the pixel count
    ho_pad = nb * th
    hp = 2 * ho_pad + 2          # padded input height (>= h + 2)
    wp = 2 * wo + 2              # padded input width  (>= w + 2)
    wh = wo + 1

    # ---- ~1x-traffic glue (no 9x patch tensor) ----
    x_nhwc = jnp.transpose(x, (0, 2, 3, 1)).astype(compute_dtype)
    xpad = jnp.pad(x_nhwc, ((0, 0),
                            (padding, hp - h - padding),
                            (padding, wp - w - padding),
                            (0, 0)))
    # 2x2 space-to-depth parity split; grid index p = row_parity*2 + col_parity.
    mains, halos = [], []
    for pi in (0, 1):
        for pj in (0, 1):
            g = xpad[:, :, pj::2, :]                        # (N, HP, WH, C)
            mains.append(g[:, pi:pi + 2 * ho_pad:2])        # sub-rows 0 .. ho_pad-1
            halos.append(g[:, pi + 2 * th::2 * th])         # sub-rows th, 2th, ..., nb*th
    xs_main = jnp.stack(mains, axis=1)                      # (N, 4, ho_pad, WH, C)
    xs_halo = jnp.stack(halos, axis=1)                      # (N, 4, nb,     WH, C)

    # Weight as (9*C, outc), row order (ki, kj, c) to match the kernel taps.
    w_mat = jnp.transpose(weight, (2, 3, 1, 0)).reshape(9 * c, outc).astype(compute_dtype)

    out_flat = pl.pallas_call(
        _downconv_kernel,
        out_shape=jax.ShapeDtypeStruct((n, ho_pad * wo, outc), compute_dtype),
        grid_spec=pltpu.PrefetchScalarGridSpec(
            num_scalar_prefetch=0,
            grid=(n, nb),
            in_specs=[
                pl.BlockSpec((None, 4, th, wh, c), lambda b, j: (b, 0, j, 0, 0)),
                pl.BlockSpec((None, 4, 1, wh, c), lambda b, j: (b, 0, j, 0, 0)),
                pl.BlockSpec((9 * c, outc), lambda b, j: (0, 0)),
            ],
            out_specs=pl.BlockSpec((None, th * wo, outc), lambda b, j: (b, j, 0)),
        ),
        compiler_params=pltpu.CompilerParams(
            dimension_semantics=("parallel", "parallel")),
        cost_estimate=pl.CostEstimate(
            flops=2 * n * ho_pad * wo * 9 * c * outc,
            transcendentals=0,
            bytes_accessed=int((xs_main.size + xs_halo.size + w_mat.size
                                + n * ho_pad * wo * outc) * itemsize)),
    )(xs_main, xs_halo, w_mat)

    out = out_flat.reshape(n, ho_pad, wo, outc)[:, :ho]       # drop padded rows
    return jnp.transpose(out, (0, 3, 1, 2)).astype(x.dtype)   # -> NCHW


# ------------------------------ reference ---------------------------------- #
def _reference(x, weight, stride=2, padding=1):
    y = jax.lax.conv_general_dilated(
        x, weight,
        window_strides=(stride, stride),
        padding=((padding, padding), (padding, padding)),
        dimension_numbers=("NCHW", "OIHW", "NCHW"))
    return jnp.where(y > 0, y, 0.2 * y)


if __name__ == "__main__":
    key = jax.random.PRNGKey(0)
    kx, kwt = jax.random.split(key)

    n, inc, h, w = 2, 4, 16, 16
    outc = 8
    x = jax.random.normal(kx, (n, inc, h, w), dtype=jnp.float32)
    weight = 0.1 * jax.random.normal(kwt, (outc, inc, 3, 3), dtype=jnp.float32)

    fwd = jax.jit(down_conv_forward)
    out = jax.block_until_ready(fwd(x, weight))

    ref = _reference(x, weight)
    assert out.shape == (n, outc, h // 2, w // 2), out.shape
    assert jnp.allclose(out, ref, atol=1e-4, rtol=1e-4), "mismatch vs XLA conv reference"

    print("KERNEL_OK")
</pallas_src>

<mosaic_0001>
module attributes {stable_mosaic.version = 11 : i64} {
  func.func @_downconv_kernel(%arg0: i32, %arg1: i32, %arg2: memref<1x4x8x9x4xf32, #tpu.memory_space<vmem>>, %arg3: memref<1x4x1x9x4xf32, #tpu.memory_space<vmem>>, %arg4: memref<36x8xf32, #tpu.memory_space<vmem>>, %arg5: memref<1x64x8xf32, #tpu.memory_space<vmem>>) attributes {dimension_semantics = [#tpu.dimension_semantics<parallel>, #tpu.dimension_semantics<parallel>], iteration_bounds = array<i64: 2, 1>, scalar_prefetch = 0 : i64, scratch_operands = 0 : i64, tpu.core_type = #tpu.core_type<tc>, window_params = [{transform_indices = @transform_0, window_bounds = array<i64: 1, 4, 8, 9, 4>}, {transform_indices = @transform_1, window_bounds = array<i64: 1, 4, 1, 9, 4>}, {pipeline_mode = #tpu.pipeline_mode<synchronous>, transform_indices = @transform_2, window_bounds = array<i64: 36, 8>}, {transform_indices = @transform_3, window_bounds = array<i64: 1, 64, 8>}]} {
    %cst = arith.constant 0.000000e+00 : f32
    %0 = vector.broadcast %cst : f32 to vector<64x8xf32>
    %c0 = arith.constant 0 : index
    %c0_0 = arith.constant 0 : index
    %c0_1 = arith.constant 0 : index
    %c0_2 = arith.constant 0 : index
    %c0_3 = arith.constant 0 : index
    %1 = vector.load %arg2[%c0, %c0_0, %c0_1, %c0_2, %c0_3] : memref<1x4x8x9x4xf32, #tpu.memory_space<vmem>>, vector<1x1x8x8x4xf32>
    %2 = vector.shape_cast %1 : vector<1x1x8x8x4xf32> to vector<8x8x4xf32>
    %3 = vector.shape_cast %2 : vector<8x8x4xf32> to vector<64x4xf32>
    %c0_4 = arith.constant 0 : index
    %c0_5 = arith.constant 0 : index
    %4 = vector.load %arg4[%c0_4, %c0_5] : memref<36x8xf32, #tpu.memory_space<vmem>>, vector<4x8xf32>
    %cst_6 = arith.constant dense<0.000000e+00> : vector<64x8xf32>
    %5 = tpu.matmul %3, %4, %cst_6 {dimension_numbers = #tpu.dot_dimension_numbers<[1], [0], [0], [1], [0, 0, 1, 1], [], []>} : vector<64x4xf32>, vector<4x8xf32>, vector<64x8xf32> -> vector<64x8xf32>
    %6 = arith.addf %0, %5 : vector<64x8xf32>
    %c0_7 = arith.constant 0 : index
    %c1 = arith.constant 1 : index
    %c0_8 = arith.constant 0 : index
    %c0_9 = arith.constant 0 : index
    %c0_10 = arith.constant 0 : index
    %7 = vector.load %arg2[%c0_7, %c1, %c0_8, %c0_9, %c0_10] : memref<1x4x8x9x4xf32, #tpu.memory_space<vmem>>, vector<1x1x8x8x4xf32>
    %8 = vector.shape_cast %7 : vector<1x1x8x8x4xf32> to vector<8x8x4xf32>
    %9 = vector.shape_cast %8 : vector<8x8x4xf32> to vector<64x4xf32>
    %c4 = arith.constant 4 : index
    %c0_11 = arith.constant 0 : index
    %10 = vector.load %arg4[%c4, %c0_11] : memref<36x8xf32, #tpu.memory_space<vmem>>, vector<4x8xf32>
    %cst_12 = arith.constant dense<0.000000e+00> : vector<64x8xf32>
    %11 = tpu.matmul %9, %10, %cst_12 {dimension_numbers = #tpu.dot_dimension_numbers<[1], [0], [0], [1], [0, 0, 1, 1], [], []>} : vector<64x4xf32>, vector<4x8xf32>, vector<64x8xf32> -> vector<64x8xf32>
    %12 = arith.addf %6, %11 : vector<64x8xf32>
    %c0_13 = arith.constant 0 : index
    %c0_14 = arith.constant 0 : index
    %c0_15 = arith.constant 0 : index
    %c1_16 = arith.constant 1 : index
    %c0_17 = arith.constant 0 : index
    %13 = vector.load %arg2[%c0_13, %c0_14, %c0_15, %c1_16, %c0_17] : memref<1x4x8x9x4xf32, #tpu.memory_space<vmem>>, vector<1x1x8x8x4xf32>
    %14 = vector.shape_cast %13 : vector<1x1x8x8x4xf32> to vector<8x8x4xf32>
    %15 = vector.shape_cast %14 : vector<8x8x4xf32> to vector<64x4xf32>
    %c8 = arith.constant 8 : index
    %c0_18 = arith.constant 0 : index
    %16 = vector.load %arg4[%c8, %c0_18] : memref<36x8xf32, #tpu.memory_space<vmem>>, vector<4x8xf32>
    %cst_19 = arith.constant dense<0.000000e+00> : vector<64x8xf32>
    %17 = tpu.matmul %15, %16, %cst_19 {dimension_numbers = #tpu.dot_dimension_numbers<[1], [0], [0], [1], [0, 0, 1, 1], [], []>} : vector<64x4xf32>, vector<4x8xf32>, vector<64x8xf32> -> vector<64x8xf32>
    %18 = arith.addf %12, %17 : vector<64x8xf32>
    %c0_20 = arith.constant 0 : index
    %c2 = arith.constant 2 : index
    %c0_21 = arith.constant 0 : index
    %c0_22 = arith.constant 0 : index
    %c0_23 = arith.constant 0 : index
    %19 = vector.load %arg2[%c0_20, %c2, %c0_21, %c0_22, %c0_23] : memref<1x4x8x9x4xf32, #tpu.memory_space<vmem>>, vector<1x1x8x8x4xf32>
    %20 = vector.shape_cast %19 : vector<1x1x8x8x4xf32> to vector<8x8x4xf32>
    %21 = vector.shape_cast %20 : vector<8x8x4xf32> to vector<64x4xf32>
    %c12 = arith.constant 12 : index
    %c0_24 = arith.constant 0 : index
    %22 = vector.load %arg4[%c12, %c0_24] : memref<36x8xf32, #tpu.memory_space<vmem>>, vector<4x8xf32>
    %cst_25 = arith.constant dense<0.000000e+00> : vector<64x8xf32>
    %23 = tpu.matmul %21, %22, %cst_25 {dimension_numbers = #tpu.dot_dimension_numbers<[1], [0], [0], [1], [0, 0, 1, 1], [], []>} : vector<64x4xf32>, vector<4x8xf32>, vector<64x8xf32> -> vector<64x8xf32>
    %24 = arith.addf %18, %23 : vector<64x8xf32>
    %c0_26 = arith.constant 0 : index
    %c3 = arith.constant 3 : index
    %c0_27 = arith.constant 0 : index
    %c0_28 = arith.constant 0 : index
    %c0_29 = arith.constant 0 : index
    %25 = vector.load %arg2[%c0_26, %c3, %c0_27, %c0_28, %c0_29] : memref<1x4x8x9x4xf32, #tpu.memory_space<vmem>>, vector<1x1x8x8x4xf32>
    %26 = vector.shape_cast %25 : vector<1x1x8x8x4xf32> to vector<8x8x4xf32>
    %27 = vector.shape_cast %26 : vector<8x8x4xf32> to vector<64x4xf32>
    %c16 = arith.constant 16 : index
    %c0_30 = arith.constant 0 : index
    %28 = vector.load %arg4[%c16, %c0_30] : memref<36x8xf32, #tpu.memory_space<vmem>>, vector<4x8xf32>
    %cst_31 = arith.constant dense<0.000000e+00> : vector<64x8xf32>
    %29 = tpu.matmul %27, %28, %cst_31 {dimension_numbers = #tpu.dot_dimension_numbers<[1], [0], [0], [1], [0, 0, 1, 1], [], []>} : vector<64x4xf32>, vector<4x8xf32>, vector<64x8xf32> -> vector<64x8xf32>
    %30 = arith.addf %24, %29 : vector<64x8xf32>
    %c0_32 = arith.constant 0 : index
    %c2_33 = arith.constant 2 : index
    %c0_34 = arith.constant 0 : index
    %c1_35 = arith.constant 1 : index
    %c0_36 = arith.constant 0 : index
    %31 = vector.load %arg2[%c0_32, %c2_33, %c0_34, %c1_35, %c0_36] : memref<1x4x8x9x4xf32, #tpu.memory_space<vmem>>, vector<1x1x8x8x4xf32>
    %32 = vector.shape_cast %31 : vector<1x1x8x8x4xf32> to vector<8x8x4xf32>
    %33 = vector.shape_cast %32 : vector<8x8x4xf32> to vector<64x4xf32>
    %c20 = arith.constant 20 : index
    %c0_37 = arith.constant 0 : index
    %34 = vector.load %arg4[%c20, %c0_37] : memref<36x8xf32, #tpu.memory_space<vmem>>, vector<4x8xf32>
    %cst_38 = arith.constant dense<0.000000e+00> : vector<64x8xf32>
    %35 = tpu.matmul %33, %34, %cst_38 {dimension_numbers = #tpu.dot_dimension_numbers<[1], [0], [0], [1], [0, 0, 1, 1], [], []>} : vector<64x4xf32>, vector<4x8xf32>, vector<64x8xf32> -> vector<64x8xf32>
    %36 = arith.addf %30, %35 : vector<64x8xf32>
    %c0_39 = arith.constant 0 : index
    %c0_40 = arith.constant 0 : index
    %c1_41 = arith.constant 1 : index
    %c0_42 = arith.constant 0 : index
    %c0_43 = arith.constant 0 : index
    %37 = vector.load %arg2[%c0_39, %c0_40, %c1_41, %c0_42, %c0_43] : memref<1x4x8x9x4xf32, #tpu.memory_space<vmem>>, vector<1x1x7x8x4xf32>
    %38 = vector.shape_cast %37 : vector<1x1x7x8x4xf32> to vector<7x8x4xf32>
    %c0_44 = arith.constant 0 : index
    %c0_45 = arith.constant 0 : index
    %c0_46 = arith.constant 0 : index
    %c0_47 = arith.constant 0 : index
    %c0_48 = arith.constant 0 : index
    %39 = vector.load %arg3[%c0_44, %c0_45, %c0_46, %c0_47, %c0_48] : memref<1x4x1x9x4xf32, #tpu.memory_space<vmem>>, vector<1x1x1x8x4xf32>
    %40 = vector.shape_cast %39 : vector<1x1x1x8x4xf32> to vector<1x8x4xf32>
    %41 = tpu.concatenate %38, %40 in 0 : vector<7x8x4xf32>, vector<1x8x4xf32> -> vector<8x8x4xf32>
    %42 = vector.shape_cast %41 : vector<8x8x4xf32> to vector<64x4xf32>
    %c24 = arith.constant 24 : index
    %c0_49 = arith.constant 0 : index
    %43 = vector.load %arg4[%c24, %c0_49] : memref<36x8xf32, #tpu.memory_space<vmem>>, vector<4x8xf32>
    %cst_50 = arith.constant dense<0.000000e+00> : vector<64x8xf32>
    %44 = tpu.matmul %42, %43, %cst_50 {dimension_numbers = #tpu.dot_dimension_numbers<[1], [0], [0], [1], [0, 0, 1, 1], [], []>} : vector<64x4xf32>, vector<4x8xf32>, vector<64x8xf32> -> vector<64x8xf32>
    %45 = arith.addf %36, %44 : vector<64x8xf32>
    %c0_51 = arith.constant 0 : index
    %c1_52 = arith.constant 1 : index
    %c1_53 = arith.constant 1 : index
    %c0_54 = arith.constant 0 : index
    %c0_55 = arith.constant 0 : index
    %46 = vector.load %arg2[%c0_51, %c1_52, %c1_53, %c0_54, %c0_55] : memref<1x4x8x9x4xf32, #tpu.memory_space<vmem>>, vector<1x1x7x8x4xf32>
    %47 = vector.shape_cast %46 : vector<1x1x7x8x4xf32> to vector<7x8x4xf32>
    %c0_56 = arith.constant 0 : index
    %c1_57 = arith.constant 1 : index
    %c0_58 = arith.constant 0 : index
    %c0_59 = arith.constant 0 : index
    %c0_60 = arith.constant 0 : index
    %48 = vector.load %arg3[%c0_56, %c1_57, %c0_58, %c0_59, %c0_60] : memref<1x4x1x9x4xf32, #tpu.memory_space<vmem>>, vector<1x1x1x8x4xf32>
    %49 = vector.shape_cast %48 : vector<1x1x1x8x4xf32> to vector<1x8x4xf32>
    %50 = tpu.concatenate %47, %49 in 0 : vector<7x8x4xf32>, vector<1x8x4xf32> -> vector<8x8x4xf32>
    %51 = vector.shape_cast %50 : vector<8x8x4xf32> to vector<64x4xf32>
    %c28 = arith.constant 28 : index
    %c0_61 = arith.constant 0 : index
    %52 = vector.load %arg4[%c28, %c0_61] : memref<36x8xf32, #tpu.memory_space<vmem>>, vector<4x8xf32>
    %cst_62 = arith.constant dense<0.000000e+00> : vector<64x8xf32>
    %53 = tpu.matmul %51, %52, %cst_62 {dimension_numbers = #tpu.dot_dimension_numbers<[1], [0], [0], [1], [0, 0, 1, 1], [], []>} : vector<64x4xf32>, vector<4x8xf32>, vector<64x8xf32> -> vector<64x8xf32>
    %54 = arith.addf %45, %53 : vector<64x8xf32>
    %c0_63 = arith.constant 0 : index
    %c0_64 = arith.constant 0 : index
    %c1_65 = arith.constant 1 : index
    %c1_66 = arith.constant 1 : index
    %c0_67 = arith.constant 0 : index
    %55 = vector.load %arg2[%c0_63, %c0_64, %c1_65, %c1_66, %c0_67] : memref<1x4x8x9x4xf32, #tpu.memory_space<vmem>>, vector<1x1x7x8x4xf32>
    %56 = vector.shape_cast %55 : vector<1x1x7x8x4xf32> to vector<7x8x4xf32>
    %c0_68 = arith.constant 0 : index
    %c0_69 = arith.constant 0 : index
    %c0_70 = arith.constant 0 : index
    %c1_71 = arith.constant 1 : index
    %c0_72 = arith.constant 0 : index
    %57 = vector.load %arg3[%c0_68, %c0_69, %c0_70, %c1_71, %c0_72] : memref<1x4x1x9x4xf32, #tpu.memory_space<vmem>>, vector<1x1x1x8x4xf32>
    %58 = vector.shape_cast %57 : vector<1x1x1x8x4xf32> to vector<1x8x4xf32>
    %59 = tpu.concatenate %56, %58 in 0 : vector<7x8x4xf32>, vector<1x8x4xf32> -> vector<8x8x4xf32>
    %60 = vector.shape_cast %59 : vector<8x8x4xf32> to vector<64x4xf32>
    %c32 = arith.constant 32 : index
    %c0_73 = arith.constant 0 : index
    %61 = vector.load %arg4[%c32, %c0_73] : memref<36x8xf32, #tpu.memory_space<vmem>>, vector<4x8xf32>
    %cst_74 = arith.constant dense<0.000000e+00> : vector<64x8xf32>
    %62 = tpu.matmul %60, %61, %cst_74 {dimension_numbers = #tpu.dot_dimension_numbers<[1], [0], [0], [1], [0, 0, 1, 1], [], []>} : vector<64x4xf32>, vector<4x8xf32>, vector<64x8xf32> -> vector<64x8xf32>
    %63 = arith.addf %54, %62 : vector<64x8xf32>
    %cst_75 = arith.constant 0.000000e+00 : f32
    %64 = vector.broadcast %cst_75 : f32 to vector<64x8xf32>
    %65 = arith.cmpf ogt, %63, %64 : vector<64x8xf32>
    %cst_76 = arith.constant 2.000000e-01 : f32
    %66 = vector.broadcast %cst_76 : f32 to vector<64x8xf32>
    %67 = arith.mulf %66, %63 : vector<64x8xf32>
    %68 = arith.select %65, %63, %67 : vector<64x8xi1>, vector<64x8xf32>
    %c0_77 = arith.constant 0 : index
    %c0_78 = arith.constant 0 : index
    %c0_79 = arith.constant 0 : index
    %69 = vector.load %arg5[%c0_77, %c0_78, %c0_79] : memref<1x64x8xf32, #tpu.memory_space<vmem>>, vector<1x64x8xf32>
    %70 = vector.shape_cast %69 : vector<1x64x8xf32> to vector<64x8xf32>
    %71 = vector.shape_cast %68 : vector<64x8xf32> to vector<1x64x8xf32>
    tpu.vector_store %arg5[%c0_77, %c0_78, %c0_79], %71 {strides = array<i32>} : memref<1x64x8xf32, #tpu.memory_space<vmem>>, vector<1x64x8xf32>,
    return
  }
  func.func @transform_0(%arg0: i32, %arg1: i32) -> (i32, i32, i32, i32, i32) {
    %c0_i32 = arith.constant 0 : i32
    %c0_i32_0 = arith.constant 0 : i32
    %c0_i32_1 = arith.constant 0 : i32
    %c0_i32_2 = arith.constant 0 : i32
    return %arg0, %c0_i32, %arg1, %c0_i32_0, %c0_i32_1 : i32, i32, i32, i32, i32
  }
  func.func @transform_1(%arg0: i32, %arg1: i32) -> (i32, i32, i32, i32, i32) {
    %c0_i32 = arith.constant 0 : i32
    %c0_i32_0 = arith.constant 0 : i32
    %c0_i32_1 = arith.constant 0 : i32
    %c0_i32_2 = arith.constant 0 : i32
    return %arg0, %c0_i32, %arg1, %c0_i32_0, %c0_i32_1 : i32, i32, i32, i32, i32
  }
  func.func @transform_2(%arg0: i32, %arg1: i32) -> (i32, i32) {
    %c0_i32 = arith.constant 0 : i32
    %c0_i32_0 = arith.constant 0 : i32
    %c0_i32_1 = arith.constant 0 : i32
    return %c0_i32, %c0_i32_0 : i32, i32
  }
  func.func @transform_3(%arg0: i32, %arg1: i32) -> (i32, i32, i32) {
    %c0_i32 = arith.constant 0 : i32
    %c0_i32_0 = arith.constant 0 : i32
    return %arg0, %arg1, %c0_i32 : i32, i32, i32
  }
}

</mosaic_0001>

<bundles_post_ra>
// kernel: down_conv_forward.1
= control target key start
LH: loop header
LB: loop body
LE: loop exit
PB: predicated region body
PF: predicated region fallthrough
CT: control target
= control target key end

     0   :  { %s2216_s12 = smov 0   ;;  %s2218_s13 = smov 0   ;;  %s2486_s0 = inlined_call_operand.vmem [shape: f32[2,4,8,9,4], index: 0, kind: input, shape index: {}]   ;;  %s2487_s1 = inlined_call_operand.vmem [shape: f32[2,4,1,9,4], index: 1, kind: input, shape index: {}]   ;;  %s2488_s2 = inlined_call_operand.vmem [shape: f32[36,8], index: 2, kind: input, shape index: {}]   ;;  %s2489_s3 = inlined_call_operand.vmem [shape: f32[2,64,8], index: 3, kind: output, shape index: {}]  }
   0x1   :  { %s2220_s14 = smov 0  }
   0x2 LB: > { %s25_s15 = sadd.s32 1, %s2190_s13  ;;  %p1728_p0 = scmp.ge.s32.totalorder %s2194_s14, 1  ;;  %s2194_s14 = sphi %s2220_s14, %s13_s14   ;;  %s2190_s13 = sphi %s2218_s13, %s2491_s13   ;;  %s2186_s12 = sphi %s2216_s12, %s2490_s12  }
   0x3   : > { %p27_p1 = scmp.ge.s32.totalorder %s25_s15, 2  ;;  %p175_p2 = scmp.lt.s32.totalorder %s2194_s14, 3 }
   0x5   : > { %s2493_s15 = smov (%p27_p1, %s25_s15), 0  ;;  %p176_p3 = pnand %p1728_p0, %p175_p2 }
   0x6   : > { %v265_v0 = vld [vmem:[%s2488_s2 + $0x4] sm:$0xf] (!%p176_p3)  ;;  %vm291_vm0 = vcmask (!%p176_p3), 1043456   ;;  %v2240_v1 = vld [vmem:[%s2488_s2 + $0x10] sm:$0xf] (!%p176_p3)  ;;  %p218_p4 = scmp.lt.s32.totalorder (!%p176_p3), %s2186_s12, 1 }
   0x7   : > { %179 = sbr.rel (%p176_p3) target bundleno = 307 (0x133), region = 32  ;;  %1956 = vmatprep.subr.msk.mxu1 (!%p176_p3), %vm291_vm0, %v265_v0  ;;  %2012 = vmatprep.subr.msk.mxu0 (!%p176_p3), %vm291_vm0, %v2240_v1  ;;  %v255_v2 = vld [vmem:[%s2488_s2] sm:$0xf] (!%p176_p3)  ;;  %v989_v3 = vld [vmem:[%s2488_s2 + $0x14] sm:$0xf] (!%p176_p3)  ;;  %vm266_vm1 = vcmask (!%p176_p3), 31744  }
   0x8   : > { %1957 = vmatpush3.msk.msra.mxu1 (!%p176_p3), %vm291_vm0, %v265_v0  ;;  %2013 = vmatpush3.msk.msra.mxu0 (!%p176_p3), %vm291_vm0, %v2240_v1  ;;  %v1139_v10 = vld [vmem:[%s2488_s2 + $0x18] sm:$0xf] (!%p176_p3)  ;;  %v540_v11 = vld [vmem:[%s2488_s2 + $0x8] sm:$0xf] (!%p176_p3)  ;;  %v1290_v20 = vld [vmem:[%s2488_s2 + $0x1c] sm:$0xf] (!%p176_p3) }
   0x9   : > { %1970 = vmatprep.subr.msk.mxu1 (!%p176_p3), %vm291_vm0, %v255_v2  ;;  %2026 = vmatprep.subr.msk.mxu0 (!%p176_p3), %vm291_vm0, %v989_v3  ;;  %v690_v29 = vld [vmem:[%s2488_s2 + $0xc] sm:$0xf] (!%p176_p3)  ;;  %v1439_v35 = vld [vmem:[%s2488_s2 + $0x20] sm:$0xf] (!%p176_p3)  ;;  %vm1604_vm3 = vcmask (!%p176_p3), 64512  }
   0xe   : > { %s2495_s12 = smov (!%p218_p4, %s2186_s12), 1 }
   0xf   : > { %s1872_s24 = sshll.u32 %s2495_s12, 9  ;;  %s1873_s11 = sshll.u32 %s2495_s12, 6 }
  0x10   : > { %s2262_s27 = scalar_lea.vmem %s2486_s0, %s1872_s24  ;;  %s2381_s18 = scalar_lea.vmem %s2487_s1, %s1873_s11 }
  0x11   : > { %v1735_v4 = vld [vmem:[%s2262_s27 + $0x80] sm:$0xff]  ;;  %v2267_v6 = vld [vmem:[%s2262_s27 + $0x90] sm:$0xff]  ;;  %s2459_s21 = scalar_lea.vmem %s2489_s3, %s1873_s11 }
  0x12   : > { %v1787_v5 = vld [vmem:[%s2262_s27 + $0x180] sm:$0xff]  ;;  %1958 = vmatprep.mubr.msk.f32.mxu1 %vm266_vm1, %v1735_v4  ;;  %v1788_v7 = vld [vmem:[%s2262_s27 + $0x190] sm:$0xff] }
  0x13   : > { %2014 = vmatprep.mubr.msk.f32.mxu0 %vm266_vm1, %v1787_v5  ;;  %v2273_v8 = vld [vmem:[%s2262_s27 + $0xa0] sm:$0xff]  ;;  %1959 = vmatmul.mubr.msk.f32.vlgmr.msra.gmra.mrb[0].mxu1 %vm266_vm1, %v2267_v6  ;;  %v2288_v12 = vld [vmem:[%s2262_s27 + $0xb0] sm:$0xff] }
  0x14   : > { %v1789_v9 = vld [vmem:[%s2262_s27 + $0x1a0] sm:$0xff]  ;;  %2015 = vmatmul.mubr.msk.f32.vlgmr.msra.gmra.mrb[0].mxu0 %vm266_vm1, %v1788_v7  ;;  %1971 = vmatpush3.msk.msra.mxu1 %vm291_vm0, %v255_v2  ;;  %v1790_v13 = vld [vmem:[%s2262_s27 + $0x1b0] sm:$0xff] }
  0x15   : > { %2027 = vmatpush3.msk.msra.mxu0 %vm291_vm0, %v989_v3  ;;  %1961 = vmatprep.mubr.msk.f32.mxu1 %vm266_vm1, %v2273_v8  ;;  %v2295_v14 = vld [vmem:[%s2262_s27 + $0xc0] sm:$0xff]  ;;  %v2307_v16 = vld [vmem:[%s2262_s27 + $0xd0] sm:$0xff] }
  0x16   : > { %2017 = vmatprep.mubr.msk.f32.mxu0 %vm266_vm1, %v1789_v9  ;;  %v1804_v15 = vld [vmem:[%s2262_s27 + $0x101] sm:$0xff]  ;;  %2040 = vmatprep.subr.msk.mxu0 %vm291_vm0, %v1139_v10  ;;  %v1805_v17 = vld [vmem:[%s2262_s27 + $0x111] sm:$0xff] }
  0x17   : > { %1984 = vmatprep.subr.msk.mxu1 %vm291_vm0, %v540_v11  ;;  %1962 = vmatmul.mubr.msk.f32.gmra.mrb[2].mxu1 %vm266_vm1, %v2288_v12  ;;  %v2311_v18 = vld [vmem:[%s2262_s27 + $0xe0] sm:$0xff]  ;;  %v2324_v21 = vld [vmem:[%s2262_s27 + $0xf0] sm:$0xff] }
  0x18   : > { %2018 = vmatmul.mubr.msk.f32.gmra.mrb[2].mxu0 %vm266_vm1, %v1790_v13  ;;  %1964 = vmatprep.mubr.msk.f32.mxu1 %vm266_vm1, %v2295_v14  ;;  %v1806_v19 = vld [vmem:[%s2262_s27 + $0x121] sm:$0xff]  ;;  %v1807_v22 = vld [vmem:[%s2262_s27 + $0x131] sm:$0xff] }
  0x19   : > { %2028 = vmatprep.mubr.msk.f32.mxu0 %vm266_vm1, %v1804_v15  ;;  %v247_v23 = vld [vmem:[%s2262_s27] sm:$0xff]  ;;  %v248_v25 = vld [vmem:[%s2262_s27 + $0x10] sm:$0xff] }
  0x1a   : > { %v1808_v24 = vld [vmem:[%s2262_s27 + $0x141] sm:$0xff]  ;;  %v1809_v26 = vld [vmem:[%s2262_s27 + $0x151] sm:$0xff] }
  0x1b   : > { %1965 = vmatmul.mubr.msk.f32.gmra.mrb[4].mxu1 %vm266_vm1, %v2307_v16  ;;  %v249_v27 = vld [vmem:[%s2262_s27 + $0x20] sm:$0xff]  ;;  %v250_v30 = vld [vmem:[%s2262_s27 + $0x30] sm:$0xff] }
  0x1c   : > { %2029 = vmatmul.mubr.msk.f32.vlgmr.msra.gmra.mrb[0].mxu0 %vm266_vm1, %v1805_v17  ;;  %1967 = vmatprep.mubr.msk.f32.mxu1 %vm266_vm1, %v2311_v18  ;;  %v1810_v28 = vld [vmem:[%s2262_s27 + $0x161] sm:$0xff]  ;;  %v1811_v31 = vld [vmem:[%s2262_s27 + $0x171] sm:$0xff] }
  0x1d   : > { %2041 = vmatpush3.msk.msra.mxu0 %vm291_vm0, %v1139_v10  ;;  %2031 = vmatprep.mubr.msk.f32.mxu0 %vm266_vm1, %v1806_v19  ;;  %v251_v32 = vld [vmem:[%s2262_s27 + $0x40] sm:$0xff]  ;;  %v252_v33 = vld [vmem:[%s2262_s27 + $0x50] sm:$0xff] }
  0x1e   : > { %2054 = vmatprep.subr.msk.mxu0 %vm291_vm0, %v1290_v20  ;;  %v253_v34 = vld [vmem:[%s2262_s27 + $0x60] sm:$0xff]  ;;  %v254_v36 = vld [vmem:[%s2262_s27 + $0x70] sm:$0xff] }
  0x1f   : > { %1968 = vmatmul.mubr.msk.f32.gmra.mrb[6].mxu1 %vm266_vm1, %v2324_v21  ;;  %v532_v37 = vld [vmem:[%s2262_s27 + $0x1] sm:$0xff]  ;;  %v533_v38 = vld [vmem:[%s2262_s27 + $0x11] sm:$0xff] }
  0x20   : > { %2032 = vmatmul.mubr.msk.f32.gmra.mrb[2].mxu0 %vm266_vm1, %v1807_v22  ;;  %1972 = vmatprep.mubr.msk.f32.mxu1 %vm266_vm1, %v247_v23  ;;  %v534_v39 = vld [vmem:[%s2262_s27 + $0x21] sm:$0xff]  ;;  %v535_v40 = vld [vmem:[%s2262_s27 + $0x31] sm:$0xff] }
  0x21   : > { %2034 = vmatprep.mubr.msk.f32.mxu0 %vm266_vm1, %v1808_v24  ;;  %v1138_v41 = vld [vmem:[%s2381_s18] sm:$0xff]  ;;  %v537_v43 = vld [vmem:[%s2262_s27 + $0x51] sm:$0xff] }
  0x22   : > { %v536_v42 = vld [vmem:[%s2262_s27 + $0x41] sm:$0xff]  ;;  %v539_v45 = vld [vmem:[%s2262_s27 + $0x71] sm:$0xff] }
  0x23   : > { %1973 = vmatmul.mubr.msk.f32.vlgmr.msra.gmra.mrb[0].mxu1 %vm266_vm1, %v248_v25  ;;  %v538_v44 = vld [vmem:[%s2262_s27 + $0x61] sm:$0xff]  ;;  %v1771_v47 = vld [vmem:[%s2262_s27 + $0x110] sm:$0xff] }
  0x24   : > { %2035 = vmatmul.mubr.msk.f32.gmra.mrb[4].mxu0 %vm266_vm1, %v1809_v26  ;;  %1985 = vmatpush3.msk.msra.mxu1 %vm291_vm0, %v540_v11  ;;  %v1770_v46 = vld [vmem:[%s2262_s27 + $0x100] sm:$0xff]  ;;  %v1773_v49 = vld [vmem:[%s2262_s27 + $0x130] sm:$0xff] }
  0x25   : > { %1975 = vmatprep.mubr.msk.f32.mxu1 %vm266_vm1, %v249_v27  ;;  %2037 = vmatprep.mubr.msk.f32.mxu0 %vm266_vm1, %v1810_v28  ;;  %v1772_v48 = vld [vmem:[%s2262_s27 + $0x120] sm:$0xff]  ;;  %v1844_v50 = vld [vmem:[%s2381_s18 + $0x10] sm:$0xff] }
  0x26   : > { %1998 = vmatprep.subr.msk.mxu1 %vm291_vm0, %v690_v29  ;;  %v1774_v51 = vld [vmem:[%s2262_s27 + $0x140] sm:$0xff]  ;;  %v1775_v52 = vld [vmem:[%s2262_s27 + $0x150] sm:$0xff] }
  0x27   : > { %1976 = vmatmul.mubr.msk.f32.gmra.mrb[2].mxu1 %vm266_vm1, %v250_v30  ;;  %v1776_v53 = vld [vmem:[%s2262_s27 + $0x160] sm:$0xff]  ;;  %v1777_v54 = vld [vmem:[%s2262_s27 + $0x170] sm:$0xff] }
  0x28   : > { %2038 = vmatmul.mubr.msk.f32.gmra.mrb[6].mxu0 %vm266_vm1, %v1811_v31  ;;  %1978 = vmatprep.mubr.msk.f32.mxu1 %vm266_vm1, %v251_v32  ;;  %v1791_v55 = vld [vmem:[%s2262_s27 + $0x1c0] sm:$0xff]  ;;  %v1792_v56 = vld [vmem:[%s2262_s27 + $0x1d0] sm:$0xff] }
  0x29   : > { %2042 = vmatprep.mubr.msk.f32.mxu0 %vm266_vm1, %v248_v25  ;;  %v1793_v57 = vld [vmem:[%s2262_s27 + $0x1e0] sm:$0xff]  ;;  %v1794_v58 = vld [vmem:[%s2262_s27 + $0x1f0] sm:$0xff] }
  0x2a   : > { %v1438_v59 = vld [vmem:[%s2381_s18 + $0x1] sm:$0xff] }
  0x2b   : > { %1979 = vmatmul.mubr.msk.f32.gmra.mrb[4].mxu1 %vm266_vm1, %v252_v33 }
  0x2c   : > { %2043 = vmatmul.mubr.msk.f32.vlgmr.msra.gmra.mrb[0].mxu0 %vm266_vm1, %v249_v27  ;;  %1981 = vmatprep.mubr.msk.f32.mxu1 %vm266_vm1, %v253_v34 }
  0x2d   : > { %2055 = vmatpush3.msk.msra.mxu0 %vm291_vm0, %v1290_v20  ;;  %2045 = vmatprep.mubr.msk.f32.mxu0 %vm266_vm1, %v250_v30 }
  0x2e   : > { %2068 = vmatprep.subr.msk.mxu0 %vm291_vm0, %v1439_v35 }
  0x2f   : > { %1982 = vmatmul.mubr.msk.f32.gmra.mrb[6].mxu1 %vm266_vm1, %v254_v36 }
  0x30   : > { %2046 = vmatmul.mubr.msk.f32.gmra.mrb[2].mxu0 %vm266_vm1, %v251_v32  ;;  %1986 = vmatprep.mubr.msk.f32.mxu1 %vm266_vm1, %v532_v37 }
  0x31   : > { %2048 = vmatprep.mubr.msk.f32.mxu0 %vm266_vm1, %v252_v33 }
  0x33   : > { %1987 = vmatmul.mubr.msk.f32.vlgmr.msra.gmra.mrb[0].mxu1 %vm266_vm1, %v533_v38 }
  0x34   : > { %2049 = vmatmul.mubr.msk.f32.gmra.mrb[4].mxu0 %vm266_vm1, %v253_v34  ;;  %1999 = vmatpush3.msk.msra.mxu1 %vm291_vm0, %v690_v29 }
  0x35   : > { %1989 = vmatprep.mubr.msk.f32.mxu1 %vm266_vm1, %v534_v39  ;;  %2051 = vmatprep.mubr.msk.f32.mxu0 %vm266_vm1, %v254_v36 }
  0x36   : > { %2082 = vmatprep.subr.msk.mxu1 %vm291_vm0, %v2240_v1 }
  0x37   : > { %1990 = vmatmul.mubr.msk.f32.gmra.mrb[2].mxu1 %vm266_vm1, %v535_v40 }
  0x38   : > { %2052 = vmatmul.mubr.msk.f32.gmra.mrb[6].mxu0 %vm266_vm1, %v1138_v41  ;;  %1992 = vmatprep.mubr.msk.f32.mxu1 %vm266_vm1, %v536_v42 }
  0x39   : > { %2056 = vmatprep.mubr.msk.f32.mxu0 %vm266_vm1, %v2267_v6 }
  0x3b   : > { %1993 = vmatmul.mubr.msk.f32.gmra.mrb[4].mxu1 %vm266_vm1, %v537_v43 }
  0x3c   : > { %2057 = vmatmul.mubr.msk.f32.vlgmr.msra.gmra.mrb[0].mxu0 %vm266_vm1, %v2273_v8  ;;  %1995 = vmatprep.mubr.msk.f32.mxu1 %vm266_vm1, %v538_v44 }
  0x3d   : > { %2069 = vmatpush3.msk.msra.mxu0 %vm291_vm0, %v1439_v35  ;;  %2059 = vmatprep.mubr.msk.f32.mxu0 %vm266_vm1, %v2288_v12 }
  0x3f   : > { %1996 = vmatmul.mubr.msk.f32.gmra.mrb[6].mxu1 %vm266_vm1, %v539_v45 }
  0x40   : > { %2060 = vmatmul.mubr.msk.f32.gmra.mrb[2].mxu0 %vm266_vm1, %v2295_v14  ;;  %2000 = vmatprep.mubr.msk.f32.mxu1 %vm266_vm1, %v1770_v46 }
  0x41   : > { %2062 = vmatprep.mubr.msk.f32.mxu0 %vm266_vm1, %v2307_v16 }
  0x43   : > { %2001 = vmatmul.mubr.msk.f32.vlgmr.msra.gmra.mrb[0].mxu1 %vm266_vm1, %v1771_v47 }
  0x44   : > { %2063 = vmatmul.mubr.msk.f32.gmra.mrb[4].mxu0 %vm266_vm1, %v2311_v18  ;;  %2083 = vmatpush3.msk.msra.mxu1 %vm291_vm0, %v2240_v1 }
  0x45   : > { %2003 = vmatprep.mubr.msk.f32.mxu1 %vm266_vm1, %v1772_v48  ;;  %2065 = vmatprep.mubr.msk.f32.mxu0 %vm266_vm1, %v2324_v21 }
  0x47   : > { %2004 = vmatmul.mubr.msk.f32.gmra.mrb[2].mxu1 %vm266_vm1, %v1773_v49 }
  0x48   : > { %2066 = vmatmul.mubr.msk.f32.gmra.mrb[6].mxu0 %vm266_vm1, %v1844_v50  ;;  %2006 = vmatprep.mubr.msk.f32.mxu1 %vm266_vm1, %v1774_v51 }
  0x49   : > { %2070 = vmatprep.mubr.msk.f32.mxu0 %vm266_vm1, %v533_v38 }
  0x4b   : > { %2007 = vmatmul.mubr.msk.f32.gmra.mrb[4].mxu1 %vm266_vm1, %v1775_v52 }
  0x4c   : > { %2071 = vmatmul.mubr.msk.f32.vlgmr.msra.gmra.mrb[0].mxu0 %vm266_vm1, %v534_v39  ;;  %2009 = vmatprep.mubr.msk.f32.mxu1 %vm266_vm1, %v1776_v53 }
  0x4d   : > { %2073 = vmatprep.mubr.msk.f32.mxu0 %vm266_vm1, %v535_v40 }
  0x4f   : > { %2010 = vmatmul.mubr.msk.f32.gmra.mrb[6].mxu1 %vm266_vm1, %v1777_v54 }
  0x50   : > { %2074 = vmatmul.mubr.msk.f32.gmra.mrb[2].mxu0 %vm266_vm1, %v536_v42  ;;  %2020 = vmatprep.mubr.msk.f32.mxu1 %vm266_vm1, %v1791_v55 }
  0x51   : > { %2076 = vmatprep.mubr.msk.f32.mxu0 %vm266_vm1, %v537_v43 }
  0x53   : > { %2021 = vmatmul.mubr.msk.f32.vlgmr.msra.gmra.mrb[4].mxu1 %vm266_vm1, %v1792_v56 }
  0x54   : > { %2077 = vmatmul.mubr.msk.f32.gmra.mrb[4].mxu0 %vm266_vm1, %v538_v44  ;;  %2023 = vmatprep.mubr.msk.f32.mxu1 %vm266_vm1, %v1793_v57 }
  0x55   : > { %2079 = vmatprep.mubr.msk.f32.mxu0 %vm266_vm1, %v539_v45 }
  0x57   : > { %2024 = vmatmul.mubr.msk.f32.gmra.mrb[6].mxu1 %vm266_vm1, %v1794_v58 }
  0x58   : > { %2080 = vmatmul.mubr.msk.f32.gmra.mrb[6].mxu0 %vm266_vm1, %v1438_v59 }
 0x116   : > { %v2002_v60 = vpop.f32.mrb[0].mxu1 }
 0x117   : > { %v784_v61 = vpop.f32.mrb[1].mxu1 }
 0x11a   : > { %v2005_v62 = vpop.f32.mrb[2].mxu1 }
 0x11b   : > { %v794_v63 = vpop.f32.mrb[3].mxu1 }
 0x11f   : > { %v2072_v0 = vpop.f32.mrb[0].mxu0 }
 0x120   : > { %v2084_v1 = vadd.f32 %v2072_v0, %v2002_v60  ;;  %v1533_v2 = vpop.f32.mrb[1].mxu0 }
 0x121   : > { %v2085_v3 = vadd.f32 %v1533_v2, %v784_v61 }
 0x122   : > { %vm1581_vm2 = vcmp.gt.f32.partialorder %v2084_v1, 0.0  ;;  %v1589_v4 = vmul.f32 0.2, %v2084_v1 }
 0x123   : > { %vm1580_vm4 = vcmp.gt.f32.partialorder %v2085_v3, 0.0  ;;  %v1588_v5 = vmul.f32 0.2, %v2085_v3  ;;  %v2075_v6 = vpop.f32.mrb[2].mxu0 }
 0x124   : > { %v1597_v7 = vsel %vm1581_vm2, %v2084_v1, %v1589_v4  ;;  %v2086_v8 = vadd.f32 %v2075_v6, %v2005_v62  ;;  %v1543_v9 = vpop.f32.mrb[3].mxu0 }
 0x125   : > { %1606 = vst.msk [vmem:[%s2459_s21 + $0x8] sm:$0xff] %vm1604_vm3, %v1597_v7  ;;  %v1596_v10 = vsel %vm1580_vm4, %v2085_v3, %v1588_v5  ;;  %v2087_v11 = vadd.f32 %v1543_v9, %v794_v63 }
 0x126   : > { %1605 = vst.msk [vmem:[%s2459_s21] sm:$0xff] %vm1604_vm3, %v1596_v10  ;;  %vm1583_vm5 = vcmp.gt.f32.partialorder %v2086_v8, 0.0  ;;  %v1591_v12 = vmul.f32 0.2, %v2086_v8  ;;  %v2022_v14 = vpop.f32.mrb[4].mxu1 }
 0x127   : > { %vm1582_vm6 = vcmp.gt.f32.partialorder %v2087_v11, 0.0  ;;  %v1590_v13 = vmul.f32 0.2, %v2087_v11  ;;  %v2078_v15 = vpop.f32.mrb[4].mxu0  ;;  %v954_v18 = vpop.f32.mrb[5].mxu1 }
 0x128   : > { %v1599_v16 = vsel %vm1583_vm5, %v2086_v8, %v1591_v12  ;;  %v2088_v17 = vadd.f32 %v2078_v15, %v2022_v14  ;;  %v1553_v19 = vpop.f32.mrb[5].mxu0 }
 0x129   : > { %1608 = vst.msk [vmem:[%s2459_s21 + $0x18] sm:$0xff] %vm1604_vm3, %v1599_v16  ;;  %v1598_v20 = vsel %vm1582_vm6, %v2087_v11, %v1590_v13  ;;  %v2089_v21 = vadd.f32 %v1553_v19, %v954_v18 }
 0x12a   : > { %1607 = vst.msk [vmem:[%s2459_s21 + $0x10] sm:$0xff] %vm1604_vm3, %v1598_v20  ;;  %vm1585_vm7 = vcmp.gt.f32.partialorder %v2088_v17, 0.0  ;;  %v1593_v22 = vmul.f32 0.2, %v2088_v17  ;;  %v2025_v24 = vpop.f32.mrb[6].mxu1 }
 0x12b   : > { %vm1584_vm8 = vcmp.gt.f32.partialorder %v2089_v21, 0.0  ;;  %v1592_v23 = vmul.f32 0.2, %v2089_v21  ;;  %v2081_v25 = vpop.f32.mrb[6].mxu0  ;;  %v964_v28 = vpop.f32.mrb[7].mxu1 }
 0x12c   : > { %v1601_v26 = vsel %vm1585_vm7, %v2088_v17, %v1593_v22  ;;  %v2090_v27 = vadd.f32 %v2081_v25, %v2025_v24  ;;  %v1563_v29 = vpop.f32.mrb[7].mxu0 }
 0x12d   : > { %1610 = vst.msk [vmem:[%s2459_s21 + $0x28] sm:$0xff] %vm1604_vm3, %v1601_v26  ;;  %v1600_v30 = vsel %vm1584_vm8, %v2089_v21, %v1592_v23  ;;  %v2091_v31 = vadd.f32 %v1563_v29, %v964_v28 }
 0x12e   : > { %1609 = vst.msk [vmem:[%s2459_s21 + $0x20] sm:$0xff] %vm1604_vm3, %v1600_v30  ;;  %vm1587_vm9 = vcmp.gt.f32.partialorder %v2090_v27, 0.0  ;;  %v1595_v32 = vmul.f32 0.2, %v2090_v27 }
 0x12f   : > { %vm1586_vm10 = vcmp.gt.f32.partialorder %v2091_v31, 0.0  ;;  %v1594_v33 = vmul.f32 0.2, %v2091_v31 }
 0x130   : > { %v1603_v34 = vsel %vm1587_vm9, %v2090_v27, %v1595_v32 }
 0x131   : > { %1612 = vst.msk [vmem:[%s2459_s21 + $0x38] sm:$0xff] %vm1604_vm3, %v1603_v34  ;;  %v1602_v35 = vsel %vm1586_vm10, %v2091_v31, %v1594_v33 }
 0x132   : > { %1611 = vst.msk [vmem:[%s2459_s21 + $0x30] sm:$0xff] %vm1604_vm3, %v1602_v35 }
 0x133 PF: > { %s13_s14 = sadd.s32 1, %s2194_s14   ;;  %s2490_s12 = smov %s2190_s13 }
 0x134   : > { %p10_p5 = scmp.ge.s32.totalorder %s13_s14, 4   ;;  %s2491_s13 = smov %s2493_s15 }
 0x136   :  { %12 = sbr.rel (!%p10_p5) target bundleno = 2 (0x2), region = 71 }

</bundles_post_ra>
